<compile_context>
chip_gen: v7x
topology: tpu7x:2x2x1
jax: 0.10.0
libtpu: 0.0.40
codegen_flags: <defaults>
</compile_context>

<pallas_src>
import functools

import jax
import jax.numpy as jnp
from jax.experimental import pallas as pl
from jax.experimental.pallas import tpu as pltpu


def _round_up(x, m):
    return ((x + m - 1) // m) * m


def _cdiv(a, b):
    return (a + b - 1) // b


def _vae_kernel(latent_dim,
                x_ref, eps_ref,
                ew1, eb1, ew2, eb2, ew3, eb3,
                dw1, db1, dw2, db2, dw3, db3,
                out_ref):
    f32 = jnp.float32

    def mm(w_ref, a):
        # Weight dtype decides the MXU operand dtype (bf16 weights were
        # pre-cast once in the wrapper); accumulation is always f32.
        w = w_ref[...]
        return jnp.dot(w, a.astype(w.dtype), preferred_element_type=f32)

    # ---- encoder: Linear(input,128) -> ReLU -> Linear(128,64) -> ReLU
    xT = x_ref[...]                                    # (input_dim, TB) f32
    h = jnp.maximum(mm(ew1, xT) + eb1[...], 0.0)        # (128, TB)
    h = jnp.maximum(mm(ew2, h) + eb2[...], 0.0)         # (64, TB)

    # ---- merged encoder head (kept f32): Linear(64, 2*latent)
    enc = mm(ew3, h) + eb3[...]                         # (2*latent, TB)
    mu = enc[:latent_dim, :]                            # free sublane slice
    logvar = enc[latent_dim:, :]

    # ---- reparameterize: z = mu + eps * exp(0.5 * logvar)   (f32 VPU/EUP)
    std = jnp.exp(0.5 * logvar)
    z = mu + eps_ref[...] * std                         # (latent, TB)

    # ---- decoder: Linear(latent,64) -> ReLU -> Linear(64,128) -> ReLU
    #               -> Linear(128,input) -> Sigmoid
    d = jnp.maximum(mm(dw1, z) + db1[...], 0.0)          # (64, TB)
    d = jnp.maximum(mm(dw2, d) + db2[...], 0.0)          # (128, TB)
    d = jax.nn.sigmoid(mm(dw3, d) + db3[...])            # (input_dim, TB)

    # Single lane-dense output slab: decoded || mu || logvar along sublanes.
    out_ref[...] = jnp.concatenate([d, mu, logvar], axis=0).astype(out_ref.dtype)


def vae_forward(x, eps, params, latent_dim, *, block_b=1024,
                use_bf16_matmul=True):
    """Full VAE forward in one pallas_call, gridded over the batch.

    x:   (B, input_dim) float32
    eps: (B, latent_dim) float32  (the randn_like draw for reparameterization)
    Returns (decoded, mu, logvar), each (B, feature).
    """
    B, input_dim = x.shape
    assert eps.shape == (B, latent_dim)
    out_rows = input_dim + 2 * latent_dim

    # ---- batch tile: batch is on the lane axis -> multiple of 128.
    tb = min(_round_up(block_b, 128), _round_up(B, 128))
    # Keep >=2 grid steps when the batch is big enough so the "parallel"
    # batch axis can shard across both TensorCores on v7x.
    if _round_up(B, 128) >= 2 * 128:
        tb = min(tb, _round_up(_cdiv(B, 2), 128))
    b_pad = _round_up(B, tb)

    # ---- transpose to (features, batch) so outputs are lane-dense and the
    #      MXU N dimension is the batch tile.
    # TODO(synk): keep this transposed layout end-to-end in the surrounding
    # model so these wrapper transposes disappear.
    xT = jnp.pad(x, ((0, b_pad - B), (0, 0))).T            # (input_dim, b_pad)
    epsT = jnp.pad(eps, ((0, b_pad - B), (0, 0))).T        # (latent,   b_pad)

    # ---- weights: PyTorch layout (out, in); biases (out, 1).
    # Pre-cast hidden-layer weights to bf16 ONCE here (not per grid step);
    # encoder head (ew3) stays f32 for mu/logvar accuracy.
    def maybe_bf16(w):
        return w.astype(jnp.bfloat16) if use_bf16_matmul else w

    weights = [
        maybe_bf16(params["ew1"]), params["eb1"],
        maybe_bf16(params["ew2"]), params["eb2"],
        params["ew3"], params["eb3"],
        maybe_bf16(params["dw1"]), params["db1"],
        maybe_bf16(params["dw2"]), params["db2"],
        maybe_bf16(params["dw3"]), params["db3"],
    ]

    grid = (b_pad // tb,)

    def batch_spec(rows):
        return pl.BlockSpec((rows, tb), lambda i: (0, i))

    def resident_spec(arr):
        nd = arr.ndim
        return pl.BlockSpec(arr.shape, lambda i: (0,) * nd)

    in_specs = ([batch_spec(input_dim), batch_spec(latent_dim)]
                + [resident_spec(w) for w in weights])
    out_specs = batch_spec(out_rows)
    out_shape = jax.ShapeDtypeStruct((out_rows, b_pad), jnp.float32)

    # ---- advisory cost estimate for XLA's scheduler.
    param_bytes = sum(int(w.size) * w.dtype.itemsize for w in weights)
    flops = 2 * b_pad * (input_dim * 128 + 128 * 64 + 64 * 2 * latent_dim
                         + latent_dim * 64 + 64 * 128 + 128 * input_dim)
    transcendentals = b_pad * (latent_dim + input_dim)      # exp + sigmoid
    bytes_accessed = (4 * b_pad * (input_dim + latent_dim)  # x, eps
                      + param_bytes                         # weights
                      + 4 * b_pad * out_rows)               # output slab
    cost = pl.CostEstimate(flops=flops, transcendentals=transcendentals,
                           bytes_accessed=bytes_accessed)

    # ---- scoped-VMEM budget: double-buffered I/O tiles + intermediates +
    # resident weights, with 2x headroom (16 MiB floor, 32 MiB cap so it is
    # safe on every generation including v7x's 64 MiB physical VMEM).
    act_rows = 128 + 64 + 2 * latent_dim + latent_dim + 64 + 128 + out_rows
    vmem_bytes = (2 * 2 * 4 * tb * (input_dim + latent_dim)   # inputs, dbl-buf
                  + 2 * 4 * tb * out_rows                     # output, dbl-buf
                  + 4 * tb * act_rows                         # intermediates
                  + param_bytes)
    vmem_limit = int(min(max(2 * vmem_bytes, 16 << 20), 32 << 20))

    kernel = functools.partial(_vae_kernel, latent_dim)
    out = pl.pallas_call(
        kernel,
        out_shape=out_shape,
        grid=grid,
        in_specs=in_specs,
        out_specs=out_specs,
        compiler_params=pltpu.CompilerParams(
            dimension_semantics=("parallel",),
            vmem_limit_bytes=vmem_limit),
        cost_estimate=cost,
    )(xT, epsT, *weights)

    decoded = out[:input_dim, :B].T
    mu = out[input_dim:input_dim + latent_dim, :B].T
    logvar = out[input_dim + latent_dim:, :B].T
    return decoded, mu, logvar


def init_vae_params(key, input_dim, latent_dim):
    """Deterministic init mirroring nn.Linear.

    Weights in PyTorch layout (out_features, in_features); biases (out, 1)."""
    dims = [(input_dim, 128), (128, 64), (64, latent_dim * 2),
            (latent_dim, 64), (64, 128), (128, input_dim)]
    wnames = ["ew1", "ew2", "ew3", "dw1", "dw2", "dw3"]
    bnames = ["eb1", "eb2", "eb3", "db1", "db2", "db3"]

    params = {}
    keys = jax.random.split(key, 12)
    for i, ((fan_in, fan_out), wn, bn) in enumerate(zip(dims, wnames, bnames)):
        bound = 1.0 / (fan_in ** 0.5)  # PyTorch default uniform bound
        params[wn] = jax.random.uniform(
            keys[2 * i], (fan_out, fan_in), jnp.float32, -bound, bound)
        params[bn] = jax.random.uniform(
            keys[2 * i + 1], (fan_out, 1), jnp.float32, -bound, bound)
    return params


if __name__ == "__main__":
    B = 8
    input_dim = 32
    latent_dim = 8

    key = jax.random.PRNGKey(0)
    k_param, k_x, k_eps = jax.random.split(key, 3)

    params = init_vae_params(k_param, input_dim, latent_dim)
    x = jax.random.normal(k_x, (B, input_dim), dtype=jnp.float32)
    # eps plays the role of torch.randn_like(std) in reparameterize.
    eps = jax.random.normal(k_eps, (B, latent_dim), dtype=jnp.float32)

    # Pure-JAX reference (same semantics as the PyTorch forward).
    def ref(x, eps, p):
        h = jnp.maximum(x @ p["ew1"].T + p["eb1"].T, 0.0)
        h = jnp.maximum(h @ p["ew2"].T + p["eb2"].T, 0.0)
        enc = h @ p["ew3"].T + p["eb3"].T
        mu_r, logvar_r = enc[:, :latent_dim], enc[:, latent_dim:]
        z = mu_r + eps * jnp.exp(0.5 * logvar_r)
        d = jnp.maximum(z @ p["dw1"].T + p["db1"].T, 0.0)
        d = jnp.maximum(d @ p["dw2"].T + p["db2"].T, 0.0)
        d = jax.nn.sigmoid(d @ p["dw3"].T + p["db3"].T)
        return d, mu_r, logvar_r

    d_r, mu_r, lv_r = ref(x, eps, params)

    # f32 MXU path: tight-tolerance check against the reference.
    decoded, mu, logvar = vae_forward(x, eps, params, latent_dim,
                                      use_bf16_matmul=False)
    jax.block_until_ready((decoded, mu, logvar))
    assert decoded.shape == (B, input_dim) and mu.shape == (B, latent_dim)
    assert jnp.allclose(decoded, d_r, atol=1e-5), "decoded mismatch (f32)"
    assert jnp.allclose(mu, mu_r, atol=1e-5), "mu mismatch (f32)"
    assert jnp.allclose(logvar, lv_r, atol=1e-5), "logvar mismatch (f32)"

    # bf16-operand MXU path (default; f32 accumulation, f32 encoder head).
    d_b, mu_b, lv_b = vae_forward(x, eps, params, latent_dim)
    jax.block_until_ready((d_b, mu_b, lv_b))
    assert jnp.allclose(d_b, d_r, atol=5e-2), "decoded mismatch (bf16)"
    assert jnp.allclose(mu_b, mu_r, atol=5e-2), "mu mismatch (bf16)"
    assert jnp.allclose(lv_b, lv_r, atol=5e-2), "logvar mismatch (bf16)"

    print("KERNEL_OK")
</pallas_src>

<mosaic_0001>
module attributes {stable_mosaic.version = 11 : i64} {
  func.func @_vae_kernel(%arg0: i32, %arg1: memref<32x128xf32, #tpu.memory_space<vmem>>, %arg2: memref<8x128xf32, #tpu.memory_space<vmem>>, %arg3: memref<128x32xf32, #tpu.memory_space<vmem>>, %arg4: memref<128x1xf32, #tpu.memory_space<vmem>>, %arg5: memref<64x128xf32, #tpu.memory_space<vmem>>, %arg6: memref<64x1xf32, #tpu.memory_space<vmem>>, %arg7: memref<16x64xf32, #tpu.memory_space<vmem>>, %arg8: memref<16x1xf32, #tpu.memory_space<vmem>>, %arg9: memref<64x8xf32, #tpu.memory_space<vmem>>, %arg10: memref<64x1xf32, #tpu.memory_space<vmem>>, %arg11: memref<128x64xf32, #tpu.memory_space<vmem>>, %arg12: memref<128x1xf32, #tpu.memory_space<vmem>>, %arg13: memref<32x128xf32, #tpu.memory_space<vmem>>, %arg14: memref<32x1xf32, #tpu.memory_space<vmem>>, %arg15: memref<48x128xf32, #tpu.memory_space<vmem>>) attributes {dimension_semantics = [#tpu.dimension_semantics<parallel>], iteration_bounds = array<i64: 1>, scalar_prefetch = 0 : i64, scratch_operands = 0 : i64, tpu.core_type = #tpu.core_type<tc>, window_params = [{transform_indices = @transform_0, window_bounds = array<i64: 32, 128>}, {transform_indices = @transform_1, window_bounds = array<i64: 8, 128>}, {pipeline_mode = #tpu.pipeline_mode<synchronous>, transform_indices = @transform_2, window_bounds = array<i64: 128, 32>}, {pipeline_mode = #tpu.pipeline_mode<synchronous>, transform_indices = @transform_3, window_bounds = array<i64: 128, 1>}, {pipeline_mode = #tpu.pipeline_mode<synchronous>, transform_indices = @transform_4, window_bounds = array<i64: 64, 128>}, {pipeline_mode = #tpu.pipeline_mode<synchronous>, transform_indices = @transform_5, window_bounds = array<i64: 64, 1>}, {pipeline_mode = #tpu.pipeline_mode<synchronous>, transform_indices = @transform_6, window_bounds = array<i64: 16, 64>}, {pipeline_mode = #tpu.pipeline_mode<synchronous>, transform_indices = @transform_7, window_bounds = array<i64: 16, 1>}, {pipeline_mode = #tpu.pipeline_mode<synchronous>, transform_indices = @transform_8, window_bounds = array<i64: 64, 8>}, {pipeline_mode = #tpu.pipeline_mode<synchronous>, transform_indices = @transform_9, window_bounds = array<i64: 64, 1>}, {pipeline_mode = #tpu.pipeline_mode<synchronous>, transform_indices = @transform_10, window_bounds = array<i64: 128, 64>}, {pipeline_mode = #tpu.pipeline_mode<synchronous>, transform_indices = @transform_11, window_bounds = array<i64: 128, 1>}, {pipeline_mode = #tpu.pipeline_mode<synchronous>, transform_indices = @transform_12, window_bounds = array<i64: 32, 128>}, {pipeline_mode = #tpu.pipeline_mode<synchronous>, transform_indices = @transform_13, window_bounds = array<i64: 32, 1>}, {transform_indices = @transform_14, window_bounds = array<i64: 48, 128>}]} {
    %c0 = arith.constant 0 : index
    %c0_0 = arith.constant 0 : index
    %0 = vector.load %arg1[%c0, %c0_0] : memref<32x128xf32, #tpu.memory_space<vmem>>, vector<32x128xf32>
    %c0_1 = arith.constant 0 : index
    %c0_2 = arith.constant 0 : index
    %1 = vector.load %arg3[%c0_1, %c0_2] : memref<128x32xf32, #tpu.memory_space<vmem>>, vector<128x32xf32>
    %cst = arith.constant dense<0.000000e+00> : vector<128x128xf32>
    %2 = tpu.matmul %1, %0, %cst {dimension_numbers = #tpu.dot_dimension_numbers<[1], [0], [0], [1], [0, 0, 1, 1], [], []>} : vector<128x32xf32>, vector<32x128xf32>, vector<128x128xf32> -> vector<128x128xf32>
    %c0_3 = arith.constant 0 : index
    %c0_4 = arith.constant 0 : index
    %3 = vector.load %arg4[%c0_3, %c0_4] : memref<128x1xf32, #tpu.memory_space<vmem>>, vector<128x1xf32>
    %4 = vector.broadcast %3 : vector<128x1xf32> to vector<128x128xf32>
    %5 = arith.addf %2, %4 : vector<128x128xf32>
    %cst_5 = arith.constant 0.000000e+00 : f32
    %6 = vector.broadcast %cst_5 : f32 to vector<128x128xf32>
    %7 = arith.maximumf %5, %6 : vector<128x128xf32>
    %c0_6 = arith.constant 0 : index
    %c0_7 = arith.constant 0 : index
    %8 = vector.load %arg5[%c0_6, %c0_7] : memref<64x128xf32, #tpu.memory_space<vmem>>, vector<64x128xf32>
    %cst_8 = arith.constant dense<0.000000e+00> : vector<64x128xf32>
    %9 = tpu.matmul %8, %7, %cst_8 {dimension_numbers = #tpu.dot_dimension_numbers<[1], [0], [0], [1], [0, 0, 1, 1], [], []>} : vector<64x128xf32>, vector<128x128xf32>, vector<64x128xf32> -> vector<64x128xf32>
    %c0_9 = arith.constant 0 : index
    %c0_10 = arith.constant 0 : index
    %10 = vector.load %arg6[%c0_9, %c0_10] : memref<64x1xf32, #tpu.memory_space<vmem>>, vector<64x1xf32>
    %11 = vector.broadcast %10 : vector<64x1xf32> to vector<64x128xf32>
    %12 = arith.addf %9, %11 : vector<64x128xf32>
    %cst_11 = arith.constant 0.000000e+00 : f32
    %13 = vector.broadcast %cst_11 : f32 to vector<64x128xf32>
    %14 = arith.maximumf %12, %13 : vector<64x128xf32>
    %c0_12 = arith.constant 0 : index
    %c0_13 = arith.constant 0 : index
    %15 = vector.load %arg7[%c0_12, %c0_13] : memref<16x64xf32, #tpu.memory_space<vmem>>, vector<16x64xf32>
    %cst_14 = arith.constant dense<0.000000e+00> : vector<16x128xf32>
    %16 = tpu.matmul %15, %14, %cst_14 {dimension_numbers = #tpu.dot_dimension_numbers<[1], [0], [0], [1], [0, 0, 1, 1], [], []>} : vector<16x64xf32>, vector<64x128xf32>, vector<16x128xf32> -> vector<16x128xf32>
    %c0_15 = arith.constant 0 : index
    %c0_16 = arith.constant 0 : index
    %17 = vector.load %arg8[%c0_15, %c0_16] : memref<16x1xf32, #tpu.memory_space<vmem>>, vector<16x1xf32>
    %18 = vector.broadcast %17 : vector<16x1xf32> to vector<16x128xf32>
    %19 = arith.addf %16, %18 : vector<16x128xf32>
    %20 = vector.extract_strided_slice %19 {offsets = [0, 0], sizes = [8, 128], strides = [1, 1]} : vector<16x128xf32> to vector<8x128xf32>
    %21 = vector.extract_strided_slice %19 {offsets = [8, 0], sizes = [8, 128], strides = [1, 1]} : vector<16x128xf32> to vector<8x128xf32>
    %cst_17 = arith.constant 5.000000e-01 : f32
    %22 = vector.broadcast %cst_17 : f32 to vector<8x128xf32>
    %23 = arith.mulf %22, %21 : vector<8x128xf32>
    %24 = math.exp %23 : vector<8x128xf32>
    %c0_18 = arith.constant 0 : index
    %c0_19 = arith.constant 0 : index
    %25 = vector.load %arg2[%c0_18, %c0_19] : memref<8x128xf32, #tpu.memory_space<vmem>>, vector<8x128xf32>
    %26 = arith.mulf %25, %24 : vector<8x128xf32>
    %27 = arith.addf %20, %26 : vector<8x128xf32>
    %c0_20 = arith.constant 0 : index
    %c0_21 = arith.constant 0 : index
    %28 = vector.load %arg9[%c0_20, %c0_21] : memref<64x8xf32, #tpu.memory_space<vmem>>, vector<64x8xf32>
    %cst_22 = arith.constant dense<0.000000e+00> : vector<64x128xf32>
    %29 = tpu.matmul %28, %27, %cst_22 {dimension_numbers = #tpu.dot_dimension_numbers<[1], [0], [0], [1], [0, 0, 1, 1], [], []>} : vector<64x8xf32>, vector<8x128xf32>, vector<64x128xf32> -> vector<64x128xf32>
    %c0_23 = arith.constant 0 : index
    %c0_24 = arith.constant 0 : index
    %30 = vector.load %arg10[%c0_23, %c0_24] : memref<64x1xf32, #tpu.memory_space<vmem>>, vector<64x1xf32>
    %31 = vector.broadcast %30 : vector<64x1xf32> to vector<64x128xf32>
    %32 = arith.addf %29, %31 : vector<64x128xf32>
    %cst_25 = arith.constant 0.000000e+00 : f32
    %33 = vector.broadcast %cst_25 : f32 to vector<64x128xf32>
    %34 = arith.maximumf %32, %33 : vector<64x128xf32>
    %c0_26 = arith.constant 0 : index
    %c0_27 = arith.constant 0 : index
    %35 = vector.load %arg11[%c0_26, %c0_27] : memref<128x64xf32, #tpu.memory_space<vmem>>, vector<128x64xf32>
    %cst_28 = arith.constant dense<0.000000e+00> : vector<128x128xf32>
    %36 = tpu.matmul %35, %34, %cst_28 {dimension_numbers = #tpu.dot_dimension_numbers<[1], [0], [0], [1], [0, 0, 1, 1], [], []>} : vector<128x64xf32>, vector<64x128xf32>, vector<128x128xf32> -> vector<128x128xf32>
    %c0_29 = arith.constant 0 : index
    %c0_30 = arith.constant 0 : index
    %37 = vector.load %arg12[%c0_29, %c0_30] : memref<128x1xf32, #tpu.memory_space<vmem>>, vector<128x1xf32>
    %38 = vector.broadcast %37 : vector<128x1xf32> to vector<128x128xf32>
    %39 = arith.addf %36, %38 : vector<128x128xf32>
    %cst_31 = arith.constant 0.000000e+00 : f32
    %40 = vector.broadcast %cst_31 : f32 to vector<128x128xf32>
    %41 = arith.maximumf %39, %40 : vector<128x128xf32>
    %c0_32 = arith.constant 0 : index
    %c0_33 = arith.constant 0 : index
    %42 = vector.load %arg13[%c0_32, %c0_33] : memref<32x128xf32, #tpu.memory_space<vmem>>, vector<32x128xf32>
    %cst_34 = arith.constant dense<0.000000e+00> : vector<32x128xf32>
    %43 = tpu.matmul %42, %41, %cst_34 {dimension_numbers = #tpu.dot_dimension_numbers<[1], [0], [0], [1], [0, 0, 1, 1], [], []>} : vector<32x128xf32>, vector<128x128xf32>, vector<32x128xf32> -> vector<32x128xf32>
    %c0_35 = arith.constant 0 : index
    %c0_36 = arith.constant 0 : index
    %44 = vector.load %arg14[%c0_35, %c0_36] : memref<32x1xf32, #tpu.memory_space<vmem>>, vector<32x1xf32>
    %45 = vector.broadcast %44 : vector<32x1xf32> to vector<32x128xf32>
    %46 = arith.addf %43, %45 : vector<32x128xf32>
    %47 = arith.negf %46 : vector<32x128xf32>
    %48 = math.exp %47 : vector<32x128xf32>
    %cst_37 = arith.constant 1.000000e+00 : f32
    %49 = vector.broadcast %cst_37 : f32 to vector<32x128xf32>
    %50 = arith.addf %49, %48 : vector<32x128xf32>
    %51 = arith.divf %49, %50 : vector<32x128xf32>
    %52 = tpu.concatenate %51, %20, %21 in 0 : vector<32x128xf32>, vector<8x128xf32>, vector<8x128xf32> -> vector<48x128xf32>
    %c0_38 = arith.constant 0 : index
    %c0_39 = arith.constant 0 : index
    %53 = vector.load %arg15[%c0_38, %c0_39] : memref<48x128xf32, #tpu.memory_space<vmem>>, vector<48x128xf32>
    tpu.vector_store %arg15[%c0_38, %c0_39], %52 {strides = array<i32>} : memref<48x128xf32, #tpu.memory_space<vmem>>, vector<48x128xf32>,
    return
  }
  func.func @transform_0(%arg0: i32) -> (i32, i32) {
    %c0_i32 = arith.constant 0 : i32
    %c0_i32_0 = arith.constant 0 : i32
    return %c0_i32, %arg0 : i32, i32
  }
  func.func @transform_1(%arg0: i32) -> (i32, i32) {
    %c0_i32 = arith.constant 0 : i32
    %c0_i32_0 = arith.constant 0 : i32
    return %c0_i32, %arg0 : i32, i32
  }
  func.func @transform_2(%arg0: i32) -> (i32, i32) {
    %c0_i32 = arith.constant 0 : i32
    %c0_i32_0 = arith.constant 0 : i32
    %c0_i32_1 = arith.constant 0 : i32
    return %c0_i32, %c0_i32_0 : i32, i32
  }
  func.func @transform_3(%arg0: i32) -> (i32, i32) {
    %c0_i32 = arith.constant 0 : i32
    %c0_i32_0 = arith.constant 0 : i32
    %c0_i32_1 = arith.constant 0 : i32
    return %c0_i32, %c0_i32_0 : i32, i32
  }
  func.func @transform_4(%arg0: i32) -> (i32, i32) {
    %c0_i32 = arith.constant 0 : i32
    %c0_i32_0 = arith.constant 0 : i32
    %c0_i32_1 = arith.constant 0 : i32
    return %c0_i32, %c0_i32_0 : i32, i32
  }
  func.func @transform_5(%arg0: i32) -> (i32, i32) {
    %c0_i32 = arith.constant 0 : i32
    %c0_i32_0 = arith.constant 0 : i32
    %c0_i32_1 = arith.constant 0 : i32
    return %c0_i32, %c0_i32_0 : i32, i32
  }
  func.func @transform_6(%arg0: i32) -> (i32, i32) {
    %c0_i32 = arith.constant 0 : i32
    %c0_i32_0 = arith.constant 0 : i32
    %c0_i32_1 = arith.constant 0 : i32
    return %c0_i32, %c0_i32_0 : i32, i32
  }
  func.func @transform_7(%arg0: i32) -> (i32, i32) {
    %c0_i32 = arith.constant 0 : i32
    %c0_i32_0 = arith.constant 0 : i32
    %c0_i32_1 = arith.constant 0 : i32
    return %c0_i32, %c0_i32_0 : i32, i32
  }
  func.func @transform_8(%arg0: i32) -> (i32, i32) {
    %c0_i32 = arith.constant 0 : i32
    %c0_i32_0 = arith.constant 0 : i32
    %c0_i32_1 = arith.constant 0 : i32
    return %c0_i32, %c0_i32_0 : i32, i32
  }
  func.func @transform_9(%arg0: i32) -> (i32, i32) {
    %c0_i32 = arith.constant 0 : i32
    %c0_i32_0 = arith.constant 0 : i32
    %c0_i32_1 = arith.constant 0 : i32
    return %c0_i32, %c0_i32_0 : i32, i32
  }
  func.func @transform_10(%arg0: i32) -> (i32, i32) {
    %c0_i32 = arith.constant 0 : i32
    %c0_i32_0 = arith.constant 0 : i32
    %c0_i32_1 = arith.constant 0 : i32
    return %c0_i32, %c0_i32_0 : i32, i32
  }
  func.func @transform_11(%arg0: i32) -> (i32, i32) {
    %c0_i32 = arith.constant 0 : i32
    %c0_i32_0 = arith.constant 0 : i32
    %c0_i32_1 = arith.constant 0 : i32
    return %c0_i32, %c0_i32_0 : i32, i32
  }
  func.func @transform_12(%arg0: i32) -> (i32, i32) {
    %c0_i32 = arith.constant 0 : i32
    %c0_i32_0 = arith.constant 0 : i32
    %c0_i32_1 = arith.constant 0 : i32
    return %c0_i32, %c0_i32_0 : i32, i32
  }
  func.func @transform_13(%arg0: i32) -> (i32, i32) {
    %c0_i32 = arith.constant 0 : i32
    %c0_i32_0 = arith.constant 0 : i32
    %c0_i32_1 = arith.constant 0 : i32
    return %c0_i32, %c0_i32_0 : i32, i32
  }
  func.func @transform_14(%arg0: i32) -> (i32, i32) {
    %c0_i32 = arith.constant 0 : i32
    %c0_i32_0 = arith.constant 0 : i32
    return %c0_i32, %arg0 : i32, i32
  }
}

</mosaic_0001>

<bundles_post_ra>
// kernel: tpu_custom_call.1
= control target key start
LH: loop header
LB: loop body
LE: loop exit
PB: predicated region body
PF: predicated region fallthrough
CT: control target
= control target key end

     0   :  { %v1811_v3 = vmov 0   ;;  %vm164_vm0 = vcmask 261120   ;;  %s2283_s0 = inlined_call_operand.vmem [shape: f32[32,128], index: 0, kind: input, shape index: {}]   ;;  %s2284_s1 = inlined_call_operand.vmem [shape: f32[8,128], index: 1, kind: input, shape index: {}]   ;;  %s2285_s2 = inlined_call_operand.vmem [shape: f32[128,32], index: 2, kind: input, shape index: {}]   ;;  %s2286_s3 = inlined_call_operand.vmem [shape: f32[128,1], index: 3, kind: input, shape index: {}]   ;;  %s2287_s4 = inlined_call_operand.vmem [shape: f32[64,128], index: 4, kind: input, shape index: {}]   ;;  %s2288_s5 = inlined_call_operand.vmem [shape: f32[64,1], index: 5, kind: input, shape index: {}]   ;;  %s2289_s6 = inlined_call_operand.vmem [shape: f32[16,64], index: 6, kind: input, shape index: {}]   ;;  %s2290_s7 = inlined_call_operand.vmem [shape: f32[16,1], index: 7, kind: input, shape index: {}]   ;;  %s2291_s8 = inlined_call_operand.vmem [shape: f32[64,8], index: 8, kind: input, shape index: {}]   ;;  %s2292_s9 = inlined_call_operand.vmem [shape: f32[64,1], index: 9, kind: input, shape index: {}]   ;;  %s2293_s10 = inlined_call_operand.vmem [shape: f32[128,64], index: 10, kind: input, shape index: {}]   ;;  %s2294_s11 = inlined_call_operand.vmem [shape: f32[128,1], index: 11, kind: input, shape index: {}]   ;;  %s2295_s12 = inlined_call_operand.vmem [shape: f32[32,128], index: 12, kind: input, shape index: {}]   ;;  %s2296_s13 = inlined_call_operand.vmem [shape: f32[32,1], index: 13, kind: input, shape index: {}]   ;;  %s2297_s14 = inlined_call_operand.hbm [shape: f32[48,128], index: 14, kind: output, shape index: {}]  }
   0x1   :  { %v70_v0 = vld [vmem:[%s2286_s3 + $0x10] sm:$0xff]  ;;  %v68_v1 = vld [vmem:[%s2286_s3] sm:$0xff]  ;;  %1768 = vset.pattern.permute.xlu1 %v1811_v3  ;;  %1767 = vset.pattern.permute.xlu0 %v1811_v3  ;;  %v49_v4 = vld [vmem:[%s2283_s0 + $0x8] sm:$0xff] }
   0x2   :  { %v48_v2 = vld [vmem:[%s2283_s0] sm:$0xff]  ;;  %96 = vperm.xlu1 %1768, %v70_v0   ;;  %86 = vperm.xlu0 %1767, %v68_v1   ;;  %v50_v6 = vld [vmem:[%s2283_s0 + $0x10] sm:$0xff]  ;;  %v51_v7 = vld [vmem:[%s2283_s0 + $0x18] sm:$0xff] }
   0x3   :  { %v1659_v5 = vpack.c.bf16 %v49_v4, %v48_v2  ;;  %v71_v8 = vld [vmem:[%s2286_s3 + $0x18] sm:$0xff]  ;;  %v69_v9 = vld [vmem:[%s2286_s3 + $0x8] sm:$0xff]  ;;  %v1663_v10 = vpack.c.bf16 %v51_v7, %v50_v6  ;;  %v52_v11 = vld [vmem:[%s2285_s2] sm:$0xff] }
   0x4   :  { %1480 = vmatprep.mubr.msk.f32.mxu0 %vm164_vm0, %v52_v11  ;;  %v73_v12 = vld [vmem:[%s2286_s3 + $0x28] sm:$0xff]  ;;  %v72_v13 = vld [vmem:[%s2286_s3 + $0x20] sm:$0xff]  ;;  %v54_v15 = vld [vmem:[%s2285_s2 + $0x10] sm:$0xff] }
   0x5   :  { %1660 = vmatprep.subr.bf16.mxu0 %v1659_v5  ;;  %v53_v14 = vld [vmem:[%s2285_s2 + $0x8] sm:$0xff]  ;;  %v75_v16 = vld [vmem:[%s2286_s3 + $0x38] sm:$0xff]  ;;  %v74_v17 = vld [vmem:[%s2286_s3 + $0x30] sm:$0xff] }
   0x6   :  { %1662 = vmatpush3.bf16.msra.mxu0 %v1659_v5  ;;  %101 = vperm.xlu1 %1768, %v71_v8   ;;  %v55_v18 = vld [vmem:[%s2285_s2 + $0x18] sm:$0xff]  ;;  %v56_v19 = vld [vmem:[%s2285_s2 + $0x20] sm:$0xff]  ;;  %v77_v20 = vld [vmem:[%s2286_s3 + $0x48] sm:$0xff] }
   0x7   :  { %91 = vperm.xlu0 %1767, %v69_v9   ;;  %1664 = vmatprep.subr.bf16.mxu0 %v1663_v10  ;;  %v76_v21 = vld [vmem:[%s2286_s3 + $0x40] sm:$0xff]  ;;  %v57_v22 = vld [vmem:[%s2285_s2 + $0x28] sm:$0xff]  ;;  %v58_v23 = vld [vmem:[%s2285_s2 + $0x30] sm:$0xff] }
   0x8   :  { %v79_v24 = vld [vmem:[%s2286_s3 + $0x58] sm:$0xff]  ;;  %v78_v25 = vld [vmem:[%s2286_s3 + $0x50] sm:$0xff]  ;;  %v60_v27 = vld [vmem:[%s2285_s2 + $0x40] sm:$0xff] }
   0x9   :  { %v59_v26 = vld [vmem:[%s2285_s2 + $0x38] sm:$0xff]  ;;  %v81_v28 = vld [vmem:[%s2286_s3 + $0x68] sm:$0xff]  ;;  %v80_v29 = vld [vmem:[%s2286_s3 + $0x60] sm:$0xff] }
   0xa   :  { %1666 = vmatpush3.bf16.msra.mxu0 %v1663_v10  ;;  %111 = vperm.xlu1 %1768, %v73_v12  }
   0xb   :  { %106 = vperm.xlu0 %1767, %v72_v13  }
   0xd   :  { %1481 = vmatmul.mubr.msk.f32.vlgmr.msra.gmra.mrb[0].mxu0 %vm164_vm0, %v53_v14 }
   0xe   :  { %1483 = vmatprep.mubr.msk.f32.mxu0 %vm164_vm0, %v54_v15  ;;  %121 = vperm.xlu1 %1768, %v75_v16  }
   0xf   :  { %116 = vperm.xlu0 %1767, %v74_v17  }
  0x11   :  { %1484 = vmatmul.mubr.msk.f32.gmra.mrb[2].mxu0 %vm164_vm0, %v55_v18 }
  0x12   :  { %1486 = vmatprep.mubr.msk.f32.mxu0 %vm164_vm0, %v56_v19  ;;  %131 = vperm.xlu1 %1768, %v77_v20  }
  0x13   :  { %126 = vperm.xlu0 %1767, %v76_v21  }
  0x15   :  { %1487 = vmatmul.mubr.msk.f32.gmra.mrb[4].mxu0 %vm164_vm0, %v57_v22 }
  0x16   :  { %1489 = vmatprep.mubr.msk.f32.mxu0 %vm164_vm0, %v58_v23  ;;  %141 = vperm.xlu1 %1768, %v79_v24  }
  0x17   :  { %136 = vperm.xlu0 %1767, %v78_v25  }
  0x19   :  { %1490 = vmatmul.mubr.msk.f32.gmra.mrb[6].mxu0 %vm164_vm0, %v59_v26 }
  0x1a   :  { %19 = vsyncpa [#allocation3], 0  ;;  %1492 = vmatprep.mubr.msk.f32.mxu0 %vm164_vm0, %v60_v27  ;;  %v61_v30 = vld [vmem:[%s2285_s2 + $0x48] sm:$0xff]  ;;  %151 = vperm.xlu1 %1768, %v81_v28   ;;  %v62_v31 = vld [vmem:[%s2285_s2 + $0x50] sm:$0xff]  ;;  %vm557_vm1 = vcmask 523264   ;;  %vm701_vm2 = vcmask 64512  }
  0x1b   :  { %146 = vperm.xlu0 %1767, %v80_v29   ;;  %v83_v32 = vld [vmem:[%s2286_s3 + $0x78] sm:$0xff]  ;;  %v82_v33 = vld [vmem:[%s2286_s3 + $0x70] sm:$0xff]  ;;  %v64_v35 = vld [vmem:[%s2285_s2 + $0x60] sm:$0xff] }
  0x1c   :  { %v63_v34 = vld [vmem:[%s2285_s2 + $0x58] sm:$0xff]  ;;  %v383_v36 = vld [vmem:[%s2288_s5 + $0x8] sm:$0xff]  ;;  %v382_v37 = vld [vmem:[%s2288_s5] sm:$0xff] }
  0x1d   :  { %1493 = vmatmul.mubr.msk.f32.gmra.mrb[8].mxu0 %vm164_vm0, %v61_v30  ;;  %v65_v38 = vld [vmem:[%s2285_s2 + $0x68] sm:$0xff]  ;;  %v66_v39 = vld [vmem:[%s2285_s2 + $0x70] sm:$0xff]  ;;  %v385_v40 = vld [vmem:[%s2288_s5 + $0x18] sm:$0xff] }
  0x1e   :  { %1495 = vmatprep.mubr.msk.f32.mxu0 %vm164_vm0, %v62_v31  ;;  %161 = vperm.xlu1 %1768, %v83_v32   ;;  %v384_v41 = vld [vmem:[%s2288_s5 + $0x10] sm:$0xff]  ;;  %v67_v42 = vld [vmem:[%s2285_s2 + $0x78] sm:$0xff]  ;;  %v387_v43 = vld [vmem:[%s2288_s5 + $0x28] sm:$0xff] }
  0x1f   :  { %156 = vperm.xlu0 %1767, %v82_v33   ;;  %v386_v44 = vld [vmem:[%s2288_s5 + $0x20] sm:$0xff]  ;;  %v389_v45 = vld [vmem:[%s2288_s5 + $0x38] sm:$0xff]  ;;  %v388_v46 = vld [vmem:[%s2288_s5 + $0x30] sm:$0xff] }
  0x20   :  { %v545_v47 = vld [vmem:[%s2290_s7] sm:$0xff]  ;;  %v546_v48 = vld [vmem:[%s2290_s7 + $0x8] sm:$0xff]  ;;  %v656_v51 = vld [vmem:[%s2292_s9 + $0x18] sm:$0xff] }
  0x21   :  { %1496 = vmatmul.mubr.msk.f32.gmra.mrb[10].mxu0 %vm164_vm0, %v63_v34  ;;  %v654_v49 = vld [vmem:[%s2292_s9 + $0x8] sm:$0xff]  ;;  %v653_v50 = vld [vmem:[%s2292_s9] sm:$0xff]  ;;  %v655_v52 = vld [vmem:[%s2292_s9 + $0x10] sm:$0xff] }
  0x22   :  { %1498 = vmatprep.mubr.msk.f32.mxu0 %vm164_vm0, %v64_v35  ;;  %397 = vperm.xlu1 %1768, %v383_v36   ;;  %v658_v53 = vld [vmem:[%s2292_s9 + $0x28] sm:$0xff]  ;;  %v657_v54 = vld [vmem:[%s2292_s9 + $0x20] sm:$0xff]  ;;  %v660_v55 = vld [vmem:[%s2292_s9 + $0x38] sm:$0xff] }
  0x23   :  { %392 = vperm.xlu0 %1767, %v382_v37   ;;  %v659_v56 = vld [vmem:[%s2292_s9 + $0x30] sm:$0xff]  ;;  %v856_v57 = vld [vmem:[%s2294_s11 + $0x8] sm:$0xff]  ;;  %v855_v58 = vld [vmem:[%s2294_s11] sm:$0xff] }
  0x24   :  { %v858_v59 = vld [vmem:[%s2294_s11 + $0x18] sm:$0xff]  ;;  %v857_v60 = vld [vmem:[%s2294_s11 + $0x10] sm:$0xff]  ;;  %v860_v61 = vld [vmem:[%s2294_s11 + $0x28] sm:$0xff] }
  0x25   :  { %1499 = vmatmul.mubr.msk.f32.gmra.mrb[12].mxu0 %vm164_vm0, %v65_v38  ;;  %v859_v62 = vld [vmem:[%s2294_s11 + $0x20] sm:$0xff]  ;;  %v862_v63 = vld [vmem:[%s2294_s11 + $0x38] sm:$0xff]  ;;  %v861_v0 = vld [vmem:[%s2294_s11 + $0x30] sm:$0xff] }
  0x26   :  { %1501 = vmatprep.mubr.msk.f32.mxu0 %vm164_vm0, %v66_v39  ;;  %407 = vperm.xlu1 %1768, %v385_v40   ;;  %v864_v1 = vld [vmem:[%s2294_s11 + $0x48] sm:$0xff]  ;;  %v863_v2 = vld [vmem:[%s2294_s11 + $0x40] sm:$0xff]  ;;  %v866_v3 = vld [vmem:[%s2294_s11 + $0x58] sm:$0xff] }
  0x27   :  { %402 = vperm.xlu0 %1767, %v384_v41   ;;  %v865_v4 = vld [vmem:[%s2294_s11 + $0x50] sm:$0xff]  ;;  %v868_v5 = vld [vmem:[%s2294_s11 + $0x68] sm:$0xff]  ;;  %v867_v6 = vld [vmem:[%s2294_s11 + $0x60] sm:$0xff] }
  0x28   :  { %v870_v7 = vld [vmem:[%s2294_s11 + $0x78] sm:$0xff]  ;;  %v869_v8 = vld [vmem:[%s2294_s11 + $0x70] sm:$0xff]  ;;  %v1165_v9 = vld [vmem:[%s2296_s13 + $0x8] sm:$0xff] }
  0x29   :  { %1502 = vmatmul.mubr.msk.f32.gmra.mrb[14].mxu0 %vm164_vm0, %v67_v42  ;;  %v1164_v10 = vld [vmem:[%s2296_s13] sm:$0xff]  ;;  %v1167_v11 = vld [vmem:[%s2296_s13 + $0x18] sm:$0xff]  ;;  %v1166_v12 = vld [vmem:[%s2296_s13 + $0x10] sm:$0xff] }
  0x2a   :  { %417 = vperm.xlu1 %1768, %v387_v43   ;;  %v374_v13 = vld [vmem:[%s2287_s4] sm:$0xff] }
  0x2b   :  { %412 = vperm.xlu0 %1767, %v386_v44   ;;  %1536 = vmatprep.mubr.f32.mxu1 %v374_v13 }
  0x2e   :  { %427 = vperm.xlu1 %1768, %v389_v45  }
  0x2f   :  { %422 = vperm.xlu0 %1767, %v388_v46  }
  0x32   :  { %549 = vperm.xlu1 %1768, %v545_v47  }
  0x33   :  { %554 = vperm.xlu0 %1767, %v546_v48  }
  0x36   :  { %668 = vperm.xlu1 %1768, %v654_v49  }
  0x37   :  { %663 = vperm.xlu0 %1767, %v653_v50  }
  0x3a   :  { %678 = vperm.xlu1 %1768, %v656_v51  }
  0x3b   :  { %673 = vperm.xlu0 %1767, %v655_v52  }
  0x3e   :  { %688 = vperm.xlu1 %1768, %v658_v53  }
  0x3f   :  { %683 = vperm.xlu0 %1767, %v657_v54  }
  0x42   :  { %698 = vperm.xlu1 %1768, %v660_v55  }
  0x43   :  { %693 = vperm.xlu0 %1767, %v659_v56  }
  0x46   :  { %878 = vperm.xlu1 %1768, %v856_v57  }
  0x47   :  { %873 = vperm.xlu0 %1767, %v855_v58  }
  0x4a   :  { %888 = vperm.xlu1 %1768, %v858_v59  }
  0x4b   :  { %883 = vperm.xlu0 %1767, %v857_v60  }
  0x4e   :  { %898 = vperm.xlu1 %1768, %v860_v61  }
  0x4f   :  { %893 = vperm.xlu0 %1767, %v859_v62  }
  0x52   :  { %908 = vperm.xlu1 %1768, %v862_v63  }
  0x53   :  { %903 = vperm.xlu0 %1767, %v861_v0  }
  0x56   :  { %918 = vperm.xlu1 %1768, %v864_v1  }
  0x57   :  { %913 = vperm.xlu0 %1767, %v863_v2  }
  0x5a   :  { %928 = vperm.xlu1 %1768, %v866_v3  }
  0x5b   :  { %923 = vperm.xlu0 %1767, %v865_v4  }
  0x5e   :  { %938 = vperm.xlu1 %1768, %v868_v5  }
  0x5f   :  { %933 = vperm.xlu0 %1767, %v867_v6  }
  0x62   :  { %948 = vperm.xlu1 %1768, %v870_v7  }
  0x63   :  { %943 = vperm.xlu0 %1767, %v869_v8  }
  0x66   :  { %1175 = vperm.xlu1 %1768, %v1165_v9  }
  0x67   :  { %1170 = vperm.xlu0 %1767, %v1164_v10  }
  0x6a   :  { %1185 = vperm.xlu1 %1768, %v1167_v11  }
  0x6b   :  { %1180 = vperm.xlu0 %1767, %v1166_v12  }
  0x81   :  { %v97_v14 = vpop.permute.xlu1 %96  ;;  %v87_v15 = vpop.permute.xlu0 %86 }
  0x85   :  { %v102_v16 = vpop.permute.xlu1 %101 }
  0x86   :  { %v92_v17 = vpop.permute.xlu0 %91 }
  0x89   :  { %v112_v18 = vpop.permute.xlu1 %111 }
  0x8a   :  { %v107_v19 = vpop.permute.xlu0 %106 }
  0x8d   :  { %v122_v25 = vpop.permute.xlu1 %121 }
  0x8e   :  { %v117_v28 = vpop.permute.xlu0 %116 }
  0x91   :  { %v132_v38 = vpop.permute.xlu1 %131 }
  0x92   :  { %v127_v41 = vpop.permute.xlu0 %126 }
  0x95   :  { %v142_v50 = vpop.permute.xlu1 %141 }
  0x96   :  { %v137_v53 = vpop.permute.xlu0 %136 }
  0x99   :  { %v152_v63 = vpop.permute.xlu1 %151 }
  0x9a   :  { %v147_v2 = vpop.permute.xlu0 %146 }
  0x9d   :  { %v162_v11 = vpop.permute.xlu1 %161 }
  0xe0   :  { %v1482_v20 = vpop.f32.mrb[0].mxu0 }
  0xe1   :  { %v285_v21 = vadd.f32 %v1482_v20, %v92_v17  ;;  %v279_v22 = vpop.f32.mrb[1].mxu0 }
  0xe2   :  { %v280_v23 = vadd.f32 %v279_v22, %v87_v15  ;;  %v375_v22 = vld [vmem:[%s2287_s4 + $0x8] sm:$0xff] }
  0xe3   :  { %v359_v24 = vmax.f32 %v285_v21, 0.0 }
  0xe4   :  { %v358_v26 = vmax.f32 %v280_v23, 0.0  ;;  %v1485_v27 = vpop.f32.mrb[2].mxu0  ;;  %v376_v23 = vld [vmem:[%s2287_s4 + $0x10] sm:$0xff] }
  0xe5   :  { %v295_v29 = vadd.f32 %v1485_v27, %v102_v16  ;;  %v289_v30 = vpop.f32.mrb[3].mxu0  ;;  %v380_v27 = vld [vmem:[%s2287_s4 + $0x30] sm:$0xff] }
  0xe6   :  { %v290_v31 = vadd.f32 %v289_v30, %v97_v14  ;;  %v1667_v32 = vpack.c.bf16 %v359_v24, %v358_v26  ;;  %v157_v14 = vpop.permute.xlu0 %156  ;;  %v377_v24 = vld [vmem:[%s2287_s4 + $0x18] sm:$0xff]  ;;  %v379_v26 = vld [vmem:[%s2287_s4 + $0x28] sm:$0xff]  ;;  %v398_v30 = vpop.permute.xlu1 %397 }
  0xe7   :  { %v361_v33 = vmax.f32 %v295_v29, 0.0  ;;  %v543_v29 = vld [vmem:[%s2289_s6] sm:$0xff] }
  0xe8   :  { %v360_v34 = vmax.f32 %v290_v31, 0.0  ;;  %v1488_v35 = vpop.f32.mrb[4].mxu0  ;;  %1668 = vmatprep.subr.bf16.mxu1 %v1667_v32  ;;  %1564 = vmatprep.mubr.msk.f32.mxu0 %vm557_vm1, %v543_v29 }
  0xe9   :  { %v305_v36 = vadd.f32 %v1488_v35, %v112_v18  ;;  %v299_v37 = vpop.f32.mrb[5].mxu0  ;;  %1670 = vmatpush3.bf16.msra.mxu1 %v1667_v32 }
  0xea   :  { %v1671_v39 = vpack.c.bf16 %v361_v33, %v360_v34  ;;  %v300_v40 = vadd.f32 %v299_v37, %v107_v19  ;;  %v393_v31 = vpop.permute.xlu0 %392  ;;  %v408_v32 = vpop.permute.xlu1 %407 }
  0xeb   :  { %v363_v42 = vmax.f32 %v305_v36, 0.0 }
  0xec   :  { %v362_v43 = vmax.f32 %v300_v40, 0.0  ;;  %v1491_v44 = vpop.f32.mrb[6].mxu0  ;;  %1672 = vmatprep.subr.bf16.mxu1 %v1671_v39 }
  0xed   :  { %v315_v45 = vadd.f32 %v1491_v44, %v122_v25  ;;  %v309_v46 = vpop.f32.mrb[7].mxu0  ;;  %1674 = vmatpush3.bf16.msra.mxu1 %v1671_v39  ;;  %v378_v25 = vld [vmem:[%s2287_s4 + $0x20] sm:$0xff] }
  0xee   :  { %v1675_v47 = vpack.c.bf16 %v363_v42, %v362_v43  ;;  %v310_v48 = vadd.f32 %v309_v46, %v117_v28  ;;  %v381_v28 = vld [vmem:[%s2287_s4 + $0x38] sm:$0xff]  ;;  %v403_v34 = vpop.permute.xlu0 %402  ;;  %v418_v43 = vpop.permute.xlu1 %417 }
  0xef   :  { %v365_v49 = vmax.f32 %v315_v45, 0.0 }
  0xf0   :  { %v364_v51 = vmax.f32 %v310_v48, 0.0  ;;  %v1494_v52 = vpop.f32.mrb[8].mxu0  ;;  %1676 = vmatprep.subr.bf16.mxu1 %v1675_v47 }
  0xf1   :  { %v325_v54 = vadd.f32 %v1494_v52, %v132_v38  ;;  %v319_v55 = vpop.f32.mrb[9].mxu0  ;;  %1678 = vmatpush3.bf16.msra.mxu1 %v1675_v47 }
  0xf2   :  { %v1679_v56 = vpack.c.bf16 %v365_v49, %v364_v51  ;;  %v320_v57 = vadd.f32 %v319_v55, %v127_v41  ;;  %v413_v46 = vpop.permute.xlu0 %412  ;;  %v428_v55 = vpop.permute.xlu1 %427 }
  0xf3   :  { %v367_v58 = vmax.f32 %v325_v54, 0.0 }
  0xf4   :  { %v366_v59 = vmax.f32 %v320_v57, 0.0  ;;  %v1497_v60 = vpop.f32.mrb[10].mxu0  ;;  %1680 = vmatprep.subr.bf16.mxu1 %v1679_v56 }
  0xf5   :  { %v335_v61 = vadd.f32 %v1497_v60, %v142_v50  ;;  %v329_v62 = vpop.f32.mrb[11].mxu0  ;;  %1682 = vmatpush3.bf16.msra.mxu1 %v1679_v56 }
  0xf6   :  { %v1683_v0 = vpack.c.bf16 %v367_v58, %v366_v59  ;;  %v330_v1 = vadd.f32 %v329_v62, %v137_v53  ;;  %v423_v58 = vpop.permute.xlu0 %422 }
  0xf7   :  { %v369_v3 = vmax.f32 %v335_v61, 0.0 }
  0xf8   :  { %v368_v4 = vmax.f32 %v330_v1, 0.0  ;;  %v1500_v5 = vpop.f32.mrb[12].mxu0  ;;  %1684 = vmatprep.subr.bf16.mxu1 %v1683_v0 }
  0xf9   :  { %v345_v6 = vadd.f32 %v1500_v5, %v152_v63  ;;  %v339_v7 = vpop.f32.mrb[13].mxu0  ;;  %1686 = vmatpush3.bf16.msra.mxu1 %v1683_v0 }
  0xfa   :  { %v1687_v8 = vpack.c.bf16 %v369_v3, %v368_v4  ;;  %v340_v9 = vadd.f32 %v339_v7, %v147_v2  ;;  %v544_v2 = vld [vmem:[%s2289_s6 + $0x8] sm:$0xff]  ;;  %v645_v3 = vld [vmem:[%s2291_s8] sm:$0xff]  ;;  %v555_v4 = vpop.permute.xlu0 %554 }
  0xfb   :  { %v371_v10 = vmax.f32 %v345_v6, 0.0  ;;  %v550_v6 = vpop.permute.xlu1 %549 }
  0xfc   :  { %v370_v12 = vmax.f32 %v340_v9, 0.0  ;;  %v1503_v13 = vpop.f32.mrb[14].mxu0  ;;  %1688 = vmatprep.subr.bf16.mxu1 %v1687_v8 }
  0xfd   :  { %v355_v15 = vadd.f32 %v1503_v13, %v162_v11  ;;  %v349_v16 = vpop.f32.mrb[15].mxu0  ;;  %1690 = vmatpush3.bf16.msra.mxu1 %v1687_v8 }
  0xfe   :  { %v1691_v17 = vpack.c.bf16 %v371_v10, %v370_v12  ;;  %v350_v18 = vadd.f32 %v349_v16, %v157_v14  ;;  %v642_v12 = vld [vmem:[%s2284_s1] sm:$0xff]  ;;  %v646_v16 = vld [vmem:[%s2291_s8 + $0x8] sm:$0xff] }
  0xff   :  { %v373_v19 = vmax.f32 %v355_v15, 0.0 }
 0x100   :  { %v372_v20 = vmax.f32 %v350_v18, 0.0  ;;  %1692 = vmatprep.subr.bf16.mxu1 %v1691_v17  ;;  %v648_v18 = vld [vmem:[%s2291_s8 + $0x18] sm:$0xff] }
 0x101   :  { %1694 = vmatpush3.bf16.msra.mxu1 %v1691_v17  ;;  %v647_v17 = vld [vmem:[%s2291_s8 + $0x10] sm:$0xff] }
 0x102   :  { %v1695_v21 = vpack.c.bf16 %v373_v19, %v372_v20  ;;  %v649_v19 = vld [vmem:[%s2291_s8 + $0x20] sm:$0xff]  ;;  %v650_v20 = vld [vmem:[%s2291_s8 + $0x28] sm:$0xff] }
 0x104   :  { %1696 = vmatprep.subr.bf16.mxu1 %v1695_v21 }
 0x105   :  { %1698 = vmatpush3.bf16.msra.mxu1 %v1695_v21  ;;  %v651_v21 = vld [vmem:[%s2291_s8 + $0x30] sm:$0xff] }
 0x108   :  { %1537 = vmatmul.mubr.f32.vlgmr.msra.gmra.mrb[0].mxu1 %v375_v22  ;;  %v652_v22 = vld [vmem:[%s2291_s8 + $0x38] sm:$0xff] }
 0x109   :  { %1539 = vmatprep.mubr.f32.mxu1 %v376_v23  ;;  %v839_v23 = vld [vmem:[%s2293_s10] sm:$0xff] }
 0x10c   :  { %1540 = vmatmul.mubr.f32.gmra.mrb[2].mxu1 %v377_v24  ;;  %v669_v24 = vpop.permute.xlu1 %668 }
 0x10d   :  { %1542 = vmatprep.mubr.f32.mxu1 %v378_v25  ;;  %v664_v25 = vpop.permute.xlu0 %663 }
 0x110   :  { %1543 = vmatmul.mubr.f32.gmra.mrb[4].mxu1 %v379_v26  ;;  %v679_v26 = vpop.permute.xlu1 %678 }
 0x111   :  { %1545 = vmatprep.mubr.f32.mxu1 %v380_v27 }
 0x114   :  { %1546 = vmatmul.mubr.f32.gmra.mrb[6].mxu1 %v381_v28  ;;  %v674_v28 = vpop.permute.xlu0 %673 }
 0x115   :  { %1597 = vmatprep.mubr.msk.f32.mxu1 %vm557_vm1, %v839_v23 }
 0x1db   :  { %v1538_v33 = vpop.f32.mrb[0].mxu1 }
 0x1dc   :  { %v502_v35 = vadd.f32 %v1538_v33, %v398_v30  ;;  %v496_v36 = vpop.f32.mrb[1].mxu1 }
 0x1dd   :  { %v497_v37 = vadd.f32 %v496_v36, %v393_v31 }
 0x1de   :  { %v536_v38 = vmax.f32 %v502_v35, 0.0 }
 0x1df   :  { %v535_v39 = vmax.f32 %v497_v37, 0.0  ;;  %v1541_v40 = vpop.f32.mrb[2].mxu1  ;;  %v689_v37 = vpop.permute.xlu1 %688 }
 0x1e0   :  { %v512_v41 = vadd.f32 %v1541_v40, %v408_v32  ;;  %v506_v42 = vpop.f32.mrb[3].mxu1  ;;  %v684_v40 = vpop.permute.xlu0 %683 }
 0x1e1   :  { %v1699_v44 = vpack.c.bf16 %v536_v38, %v535_v39  ;;  %v507_v45 = vadd.f32 %v506_v42, %v403_v34 }
 0x1e2   :  { %v538_v47 = vmax.f32 %v512_v41, 0.0 }
 0x1e3   :  { %v537_v48 = vmax.f32 %v507_v45, 0.0  ;;  %v1544_v49 = vpop.f32.mrb[4].mxu1  ;;  %1700 = vmatprep.subr.bf16.mxu0 %v1699_v44 }
 0x1e4   :  { %v522_v50 = vadd.f32 %v1544_v49, %v418_v43  ;;  %v516_v51 = vpop.f32.mrb[5].mxu1  ;;  %1702 = vmatpush3.bf16.msra.mxu0 %v1699_v44  ;;  %v699_v49 = vpop.permute.xlu1 %698 }
 0x1e5   :  { %v1703_v52 = vpack.c.bf16 %v538_v47, %v537_v48  ;;  %v517_v53 = vadd.f32 %v516_v51, %v413_v46 }
 0x1e6   :  { %v540_v54 = vmax.f32 %v522_v50, 0.0 }
 0x1e7   :  { %v539_v56 = vmax.f32 %v517_v53, 0.0  ;;  %v1547_v57 = vpop.f32.mrb[6].mxu1  ;;  %1704 = vmatprep.subr.bf16.mxu0 %v1703_v52 }
 0x1e8   :  { %v532_v59 = vadd.f32 %v1547_v57, %v428_v55  ;;  %v526_v60 = vpop.f32.mrb[7].mxu1  ;;  %1706 = vmatpush3.bf16.msra.mxu0 %v1703_v52  ;;  %v694_v52 = vpop.permute.xlu0 %693 }
 0x1e9   :  { %v1707_v61 = vpack.c.bf16 %v540_v54, %v539_v56  ;;  %v527_v62 = vadd.f32 %v526_v60, %v423_v58  ;;  %v840_v60 = vld [vmem:[%s2293_s10 + $0x8] sm:$0xff] }
 0x1ea   :  { %v542_v63 = vmax.f32 %v532_v59, 0.0 }
 0x1eb   :  { %v541_v0 = vmax.f32 %v527_v62, 0.0  ;;  %1708 = vmatprep.subr.bf16.mxu0 %v1707_v61  ;;  %v842_v62 = vld [vmem:[%s2293_s10 + $0x18] sm:$0xff] }
 0x1ec   :  { %1710 = vmatpush3.bf16.msra.mxu0 %v1707_v61  ;;  %v841_v61 = vld [vmem:[%s2293_s10 + $0x10] sm:$0xff] }
 0x1ed   :  { %v1711_v1 = vpack.c.bf16 %v542_v63, %v541_v0  ;;  %v843_v63 = vld [vmem:[%s2293_s10 + $0x20] sm:$0xff]  ;;  %v844_v0 = vld [vmem:[%s2293_s10 + $0x28] sm:$0xff] }
 0x1ef   :  { %1712 = vmatprep.subr.bf16.mxu0 %v1711_v1 }
 0x1f0   :  { %1714 = vmatpush3.bf16.msra.mxu0 %v1711_v1  ;;  %v845_v1 = vld [vmem:[%s2293_s10 + $0x30] sm:$0xff] }
 0x1f3   :  { %1565 = vmatmul.mubr.msk.f32.vlgmr.msra.gmra.mrb[16].mxu0 %vm557_vm1, %v544_v2  ;;  %v846_v2 = vld [vmem:[%s2293_s10 + $0x38] sm:$0xff] }
 0x1f4   :  { %1569 = vmatprep.mubr.msk.f32.mxu0 %vm701_vm2, %v645_v3  ;;  %v847_v3 = vld [vmem:[%s2293_s10 + $0x40] sm:$0xff] }
 0x2c6   :  { %v1566_v5 = vpop.f32.mrb[16].mxu0 }
 0x2c7   :  { %v636_v7 = vadd.f32 %v1566_v5, %v555_v4  ;;  %v630_v8 = vpop.f32.mrb[17].mxu0  ;;  %v848_v4 = vld [vmem:[%s2293_s10 + $0x48] sm:$0xff]  ;;  %v849_v5 = vld [vmem:[%s2293_s10 + $0x50] sm:$0xff] }
 0x2c8   :  { %v631_v9 = vadd.f32 %v630_v8, %v550_v6  ;;  %v850_v6 = vld [vmem:[%s2293_s10 + $0x58] sm:$0xff]  ;;  %v852_v8 = vld [vmem:[%s2293_s10 + $0x68] sm:$0xff] }
 0x2c9   :  { %v639_v10 = vmul.f32 0.5, %v636_v7  ;;  %1302 = vst [vmem:[#allocation2 + $0x28] sm:$0xff] %v636_v7  ;;  %v851_v7 = vld [vmem:[%s2293_s10 + $0x60] sm:$0xff] }
 0x2ca   :  { %1301 = vst [vmem:[#allocation2 + $0x20] sm:$0xff] %v631_v9 }
 0x2cb   :  { %v640_v11 = vmul.f32 1.442695, %v639_v10  ;;  %v854_v10 = vld [vmem:[%s2293_s10 + $0x78] sm:$0xff] }
 0x2cd   :  { %1769 = vpow2.f32 %v640_v11  ;;  %v1160_v11 = vld [vmem:[%s2295_s12] sm:$0xff] }
 0x2d7   :  { %v1770_v13 = vpop.eup %1769 }
 0x2d8   :  { %v643_v14 = vmul.f32 %v1770_v13, %v642_v12  ;;  %v879_v12 = vpop.permute.xlu1 %878  ;;  %v874_v13 = vpop.permute.xlu0 %873 }
 0x2da   :  { %v644_v15 = vadd.f32 %v643_v14, %v631_v9  ;;  %v853_v9 = vld [vmem:[%s2293_s10 + $0x70] sm:$0xff] }
 0x2dc   :  { %1567 = vmatprep.subr.mxu0 %v644_v15  ;;  %v889_v14 = vpop.permute.xlu1 %888 }
 0x2dd   :  { %1568 = vmatpush3.msra.mxu0 %v644_v15  ;;  %v884_v15 = vpop.permute.xlu0 %883 }
 0x2de   :  { %1570 = vmatmul.mubr.msk.f32.vlgmr.msra.gmra.mrb[18].mxu0 %vm701_vm2, %v646_v16 }
 0x2df   :  { %1572 = vmatprep.mubr.msk.f32.mxu0 %vm701_vm2, %v647_v17 }
 0x2e0   :  { %v899_v16 = vpop.permute.xlu1 %898 }
 0x2e1   :  { %v894_v17 = vpop.permute.xlu0 %893 }
 0x2e2   :  { %1573 = vmatmul.mubr.msk.f32.gmra.mrb[20].mxu0 %vm701_vm2, %v648_v18 }
 0x2e3   :  { %1575 = vmatprep.mubr.msk.f32.mxu0 %vm701_vm2, %v649_v19 }
 0x2e4   :  { %v909_v23 = vpop.permute.xlu1 %908 }
 0x2e6   :  { %1576 = vmatmul.mubr.msk.f32.gmra.mrb[22].mxu0 %vm701_vm2, %v650_v20 }
 0x2e7   :  { %1578 = vmatprep.mubr.msk.f32.mxu0 %vm701_vm2, %v651_v21 }
 0x2ea   :  { %1579 = vmatmul.mubr.msk.f32.gmra.mrb[24].mxu0 %vm701_vm2, %v652_v22 }
 0x2eb   :  { %1653 = vmatprep.mubr.f32.mxu0 %v1160_v11 }
 0x3b1   :  { %v1571_v27 = vpop.f32.mrb[18].mxu0 }
 0x3b2   :  { %v798_v29 = vadd.f32 %v1571_v27, %v669_v24  ;;  %v792_v30 = vpop.f32.mrb[19].mxu0 }
 0x3b3   :  { %v793_v31 = vadd.f32 %v792_v30, %v664_v25 }
 0x3b4   :  { %v832_v32 = vmax.f32 %v798_v29, 0.0 }
 0x3b5   :  { %v831_v33 = vmax.f32 %v793_v31, 0.0  ;;  %v1574_v34 = vpop.f32.mrb[20].mxu0 }
 0x3b6   :  { %v808_v35 = vadd.f32 %v1574_v34, %v679_v26  ;;  %v802_v36 = vpop.f32.mrb[21].mxu0  ;;  %v904_v26 = vpop.permute.xlu0 %903 }
 0x3b7   :  { %v1715_v38 = vpack.c.bf16 %v832_v32, %v831_v33  ;;  %v803_v39 = vadd.f32 %v802_v36, %v674_v28  ;;  %v919_v36 = vpop.permute.xlu1 %918 }
 0x3b8   :  { %v834_v41 = vmax.f32 %v808_v35, 0.0 }
 0x3b9   :  { %v833_v42 = vmax.f32 %v803_v39, 0.0  ;;  %v1577_v43 = vpop.f32.mrb[22].mxu0  ;;  %1716 = vmatprep.subr.bf16.mxu1 %v1715_v38 }
 0x3ba   :  { %v818_v44 = vadd.f32 %v1577_v43, %v689_v37  ;;  %v812_v45 = vpop.f32.mrb[23].mxu0  ;;  %1718 = vmatpush3.bf16.msra.mxu1 %v1715_v38  ;;  %v914_v39 = vpop.permute.xlu0 %913 }
 0x3bb   :  { %v1719_v46 = vpack.c.bf16 %v834_v41, %v833_v42  ;;  %v813_v47 = vadd.f32 %v812_v45, %v684_v40 }
 0x3bc   :  { %v836_v48 = vmax.f32 %v818_v44, 0.0 }
 0x3bd   :  { %v835_v50 = vmax.f32 %v813_v47, 0.0  ;;  %v1580_v51 = vpop.f32.mrb[24].mxu0  ;;  %1720 = vmatprep.subr.bf16.mxu1 %v1719_v46 }
 0x3be   :  { %v828_v53 = vadd.f32 %v1580_v51, %v699_v49  ;;  %v822_v54 = vpop.f32.mrb[25].mxu0  ;;  %1722 = vmatpush3.bf16.msra.mxu1 %v1719_v46  ;;  %v924_v51 = vpop.permute.xlu0 %923 }
 0x3bf   :  { %v1723_v55 = vpack.c.bf16 %v836_v48, %v835_v50  ;;  %v823_v56 = vadd.f32 %v822_v54, %v694_v52  ;;  %v929_v48 = vpop.permute.xlu1 %928 }
 0x3c0   :  { %v838_v57 = vmax.f32 %v828_v53, 0.0 }
 0x3c1   :  { %v837_v58 = vmax.f32 %v823_v56, 0.0  ;;  %1724 = vmatprep.subr.bf16.mxu1 %v1723_v55 }
 0x3c2   :  { %1726 = vmatpush3.bf16.msra.mxu1 %v1723_v55 }
 0x3c3   :  { %v1727_v59 = vpack.c.bf16 %v838_v57, %v837_v58 }
 0x3c5   :  { %1728 = vmatprep.subr.bf16.mxu1 %v1727_v59 }
 0x3c6   :  { %1730 = vmatpush3.bf16.msra.mxu1 %v1727_v59 }
 0x3c9   :  { %1598 = vmatmul.mubr.msk.f32.vlgmr.msra.gmra.mrb[8].mxu1 %vm557_vm1, %v840_v60 }
 0x3ca   :  { %1600 = vmatprep.mubr.msk.f32.mxu1 %vm557_vm1, %v841_v61  ;;  %v939_v61 = vpop.permute.xlu1 %938 }
 0x3cd   :  { %1601 = vmatmul.mubr.msk.f32.gmra.mrb[10].mxu1 %vm557_vm1, %v842_v62 }
 0x3ce   :  { %1603 = vmatprep.mubr.msk.f32.mxu1 %vm557_vm1, %v843_v63 }
 0x3d1   :  { %1604 = vmatmul.mubr.msk.f32.gmra.mrb[12].mxu1 %vm557_vm1, %v844_v0  ;;  %v934_v0 = vpop.permute.xlu0 %933 }
 0x3d2   :  { %1606 = vmatprep.mubr.msk.f32.mxu1 %vm557_vm1, %v845_v1 }
 0x3d5   :  { %1607 = vmatmul.mubr.msk.f32.gmra.mrb[14].mxu1 %vm557_vm1, %v846_v2 }
 0x3d6   :  { %1609 = vmatprep.mubr.msk.f32.mxu1 %vm557_vm1, %v847_v3 }
 0x3d9   :  { %1610 = vmatmul.mubr.msk.f32.gmra.mrb[16].mxu1 %vm557_vm1, %v848_v4 }
 0x3da   :  { %1612 = vmatprep.mubr.msk.f32.mxu1 %vm557_vm1, %v849_v5 }
 0x3dd   :  { %1613 = vmatmul.mubr.msk.f32.gmra.mrb[18].mxu1 %vm557_vm1, %v850_v6 }
 0x3de   :  { %1615 = vmatprep.mubr.msk.f32.mxu1 %vm557_vm1, %v851_v7 }
 0x3e1   :  { %1616 = vmatmul.mubr.msk.f32.gmra.mrb[20].mxu1 %vm557_vm1, %v852_v8 }
 0x3e2   :  { %1618 = vmatprep.mubr.msk.f32.mxu1 %vm557_vm1, %v853_v9  ;;  %v949_v9 = vpop.permute.xlu1 %948 }
 0x3e5   :  { %1619 = vmatmul.mubr.msk.f32.gmra.mrb[22].mxu1 %vm557_vm1, %v854_v10 }
 0x49c   :  { %v1599_v18 = vpop.f32.mrb[8].mxu1 }
 0x49d   :  { %v1071_v19 = vadd.f32 %v1599_v18, %v879_v12  ;;  %v1065_v20 = vpop.f32.mrb[9].mxu1  ;;  %v944_v12 = vpop.permute.xlu0 %943 }
 0x49e   :  { %v1066_v21 = vadd.f32 %v1065_v20, %v874_v13  ;;  %v1161_v20 = vld [vmem:[%s2295_s12 + $0x8] sm:$0xff] }
 0x49f   :  { %v1145_v22 = vmax.f32 %v1071_v19, 0.0 }
 0x4a0   :  { %v1144_v24 = vmax.f32 %v1066_v21, 0.0  ;;  %v1602_v25 = vpop.f32.mrb[10].mxu1  ;;  %v1162_v21 = vld [vmem:[%s2295_s12 + $0x10] sm:$0xff] }
 0x4a1   :  { %v1081_v27 = vadd.f32 %v1602_v25, %v889_v14  ;;  %v1075_v28 = vpop.f32.mrb[11].mxu1 }
 0x4a2   :  { %v1731_v29 = vpack.c.bf16 %v1145_v22, %v1144_v24  ;;  %v1076_v30 = vadd.f32 %v1075_v28, %v884_v15  ;;  %v1163_v22 = vld [vmem:[%s2295_s12 + $0x18] sm:$0xff]  ;;  %v1171_v24 = vpop.permute.xlu0 %1170  ;;  %s1812_s12 = smov [#allocation2]  }
 0x4a3   :  { %v1147_v31 = vmax.f32 %v1081_v27, 0.0  ;;  %s1308_s7 = sshll.u32 %s1812_s12, 4  ;;  %s1309_s7 = int_to_ptr.vmem [resolvable:$true] %s1308_s7 }
 0x4a4   :  { %v1146_v32 = vmax.f32 %v1076_v30, 0.0  ;;  %v1605_v33 = vpop.f32.mrb[12].mxu1  ;;  %1732 = vmatprep.subr.bf16.mxu0 %v1731_v29  ;;  %s1787_s6 = scalar_lea.vmem %s1309_s7, 768  ;;  %p1792_p1 = scmp.lt.s32.totalorder %s1309_s7, %s1309_s7 }
 0x4a5   :  { %v1091_v34 = vadd.f32 %v1605_v33, %v899_v16  ;;  %v1085_v35 = vpop.f32.mrb[13].mxu1  ;;  %1734 = vmatpush3.bf16.msra.mxu0 %v1731_v29  ;;  %p1788_p0 = scmp.ne.s32.totalorder %s1309_s7, %s1787_s6  ;;  %p1793_p2 = scmp.lt.s32.totalorder %s1787_s6, %s1787_s6 }
 0x4a6   :  { %v1735_v37 = vpack.c.bf16 %v1147_v31, %v1146_v32  ;;  %v1086_v38 = vadd.f32 %v1085_v35, %v894_v17  ;;  %v1181_v33 = vpop.permute.xlu0 %1180 }
 0x4a7   :  { %v1149_v40 = vmax.f32 %v1091_v34, 0.0  ;;  %p1794_p3 = por %p1793_p2, %p1792_p1 }
 0x4a8   :  { %v1148_v41 = vmax.f32 %v1086_v38, 0.0  ;;  %v1608_v42 = vpop.f32.mrb[14].mxu1  ;;  %1736 = vmatprep.subr.bf16.mxu0 %v1735_v37 }
 0x4a9   :  { %v1101_v43 = vadd.f32 %v1608_v42, %v909_v23  ;;  %v1095_v44 = vpop.f32.mrb[15].mxu1  ;;  %1738 = vmatpush3.bf16.msra.mxu0 %v1735_v37  ;;  %v1176_v23 = vpop.permute.xlu1 %1175  ;;  %p1795_p4 = pnand %p1794_p3, %p1788_p0 }
 0x4aa   :  { %v1739_v45 = vpack.c.bf16 %v1149_v40, %v1148_v41  ;;  %v1096_v46 = vadd.f32 %v1095_v44, %v904_v26 }
 0x4ab   :  { %v1151_v47 = vmax.f32 %v1101_v43, 0.0 }
 0x4ac   :  { %v1150_v49 = vmax.f32 %v1096_v46, 0.0  ;;  %v1611_v50 = vpop.f32.mrb[16].mxu1  ;;  %1740 = vmatprep.subr.bf16.mxu0 %v1739_v45 }
 0x4ad   :  { %v1111_v52 = vadd.f32 %v1611_v50, %v919_v36  ;;  %v1105_v53 = vpop.f32.mrb[17].mxu1  ;;  %1742 = vmatpush3.bf16.msra.mxu0 %v1739_v45  ;;  %v1186_v30 = vpop.permute.xlu1 %1185 }
 0x4ae   :  { %v1743_v54 = vpack.c.bf16 %v1151_v47, %v1150_v49  ;;  %v1106_v55 = vadd.f32 %v1105_v53, %v914_v39 }
 0x4af   :  { %v1153_v56 = vmax.f32 %v1111_v52, 0.0 }
 0x4b0   :  { %v1152_v57 = vmax.f32 %v1106_v55, 0.0  ;;  %v1614_v58 = vpop.f32.mrb[18].mxu1  ;;  %1744 = vmatprep.subr.bf16.mxu0 %v1743_v54 }
 0x4b1   :  { %v1121_v59 = vadd.f32 %v1614_v58, %v929_v48  ;;  %v1115_v60 = vpop.f32.mrb[19].mxu1  ;;  %1746 = vmatpush3.bf16.msra.mxu0 %v1743_v54 }
 0x4b2   :  { %v1747_v62 = vpack.c.bf16 %v1153_v56, %v1152_v57  ;;  %v1116_v63 = vadd.f32 %v1115_v60, %v924_v51 }
 0x4b3   :  { %v1155_v1 = vmax.f32 %v1121_v59, 0.0 }
 0x4b4   :  { %v1154_v2 = vmax.f32 %v1116_v63, 0.0  ;;  %v1617_v3 = vpop.f32.mrb[20].mxu1  ;;  %1748 = vmatprep.subr.bf16.mxu0 %v1747_v62 }
 0x4b5   :  { %v1131_v4 = vadd.f32 %v1617_v3, %v939_v61  ;;  %v1125_v5 = vpop.f32.mrb[21].mxu1  ;;  %1750 = vmatpush3.bf16.msra.mxu0 %v1747_v62 }
 0x4b6   :  { %v1751_v6 = vpack.c.bf16 %v1155_v1, %v1154_v2  ;;  %v1126_v7 = vadd.f32 %v1125_v5, %v934_v0 }
 0x4b7   :  { %v1157_v8 = vmax.f32 %v1131_v4, 0.0 }
 0x4b8   :  { %v1156_v10 = vmax.f32 %v1126_v7, 0.0  ;;  %v1620_v11 = vpop.f32.mrb[22].mxu1  ;;  %1752 = vmatprep.subr.bf16.mxu0 %v1751_v6 }
 0x4b9   :  { %v1141_v13 = vadd.f32 %v1620_v11, %v949_v9  ;;  %v1135_v14 = vpop.f32.mrb[23].mxu1  ;;  %1754 = vmatpush3.bf16.msra.mxu0 %v1751_v6 }
 0x4ba   :  { %v1755_v15 = vpack.c.bf16 %v1157_v8, %v1156_v10  ;;  %v1136_v16 = vadd.f32 %v1135_v14, %v944_v12 }
 0x4bb   :  { %v1159_v17 = vmax.f32 %v1141_v13, 0.0 }
 0x4bc   :  { %v1158_v18 = vmax.f32 %v1136_v16, 0.0  ;;  %1756 = vmatprep.subr.bf16.mxu0 %v1755_v15 }
 0x4bd   :  { %1758 = vmatpush3.bf16.msra.mxu0 %v1755_v15 }
 0x4be   :  { %v1759_v19 = vpack.c.bf16 %v1159_v17, %v1158_v18 }
 0x4c0   :  { %1760 = vmatprep.subr.bf16.mxu0 %v1759_v19 }
 0x4c1   :  { %1762 = vmatpush3.bf16.msra.mxu0 %v1759_v19 }
 0x4c4   :  { %1654 = vmatmul.mubr.f32.vlgmr.msra.gmra.mrb[26].mxu0 %v1161_v20 }
 0x4c5   :  { %1656 = vmatprep.mubr.f32.mxu0 %v1162_v21 }
 0x4c8   :  { %1657 = vmatmul.mubr.f32.gmra.mrb[28].mxu0 %v1163_v22 }
 0x597   :  { %v1655_v25 = vpop.f32.mrb[26].mxu0 }
 0x598   :  { %v1260_v26 = vadd.f32 %v1655_v25, %v1176_v23  ;;  %v1254_v27 = vpop.f32.mrb[27].mxu0 }
 0x599   :  { %v1255_v28 = vadd.f32 %v1254_v27, %v1171_v24 }
 0x59a   :  { %v1362_v29 = vmul.f32 -1.442695, %v1260_v26 }
 0x59b   :  { %v1361_v31 = vmul.f32 -1.442695, %v1255_v28  ;;  %v1658_v32 = vpop.f32.mrb[28].mxu0 }
 0x59c   :  { %1771 = vpow2.f32 %v1362_v29  ;;  %v1270_v34 = vadd.f32 %v1658_v32, %v1186_v30  ;;  %v1264_v35 = vpop.f32.mrb[29].mxu0 }
 0x59d   :  { %1773 = vpow2.f32 %v1361_v31  ;;  %v1265_v36 = vadd.f32 %v1264_v35, %v1181_v33 }
 0x59e   :  { %v1364_v37 = vmul.f32 -1.442695, %v1270_v34 }
 0x59f   :  { %v1363_v38 = vmul.f32 -1.442695, %v1265_v36 }
 0x5a0   :  { %1775 = vpow2.f32 %v1364_v37 }
 0x5a1   :  { %1777 = vpow2.f32 %v1363_v38 }
 0x5a6   :  { %v1772_v39 = vpop.eup %1771 }
 0x5a7   :  { %v1774_v40 = vpop.eup %1773  ;;  %v1286_v41 = vadd.f32 1.0, %v1772_v39 }
 0x5a8   :  { %v1285_v42 = vadd.f32 1.0, %v1774_v40 }
 0x5a9   :  { %1779 = vrcp.f32 %v1286_v41 }
 0x5aa   :  { %v1776_v43 = vpop.eup %1775  ;;  %1781 = vrcp.f32 %v1285_v42 }
 0x5ab   :  { %v1778_v44 = vpop.eup %1777  ;;  %v1288_v45 = vadd.f32 1.0, %v1776_v43 }
 0x5ac   :  { %v1287_v46 = vadd.f32 1.0, %v1778_v44 }
 0x5ad   :  { %1783 = vrcp.f32 %v1288_v45 }
 0x5ae   :  { %1785 = vrcp.f32 %v1287_v46 }
 0x5b3   :  { %v1780_v47 = vpop.eup %1779 }
 0x5b4   :  { %v1782_v48 = vpop.eup %1781  ;;  %1298 = vst [vmem:[#allocation2 + $0x8] sm:$0xff] %v1780_v47 }
 0x5b5   :  { %1297 = vst [vmem:[#allocation2] sm:$0xff] %v1782_v48 }
 0x5b7   :  { %v1784_v49 = vpop.eup %1783 }
 0x5b8   :  { %v1786_v50 = vpop.eup %1785  ;;  %1300 = vst [vmem:[#allocation2 + $0x18] sm:$0xff] %v1784_v49 }
 0x5b9   :  { %1299 = vst [vmem:[#allocation2 + $0x10] sm:$0xff] %v1786_v50 }
 0x5ba   :  { %1798 = shalt.err (!%p1795_p4)
}
 0x5bb   :  { %s1799_s26 = scalar_lea.hbm %s2297_s14, 768 }
 0x5bc   :  { %p1800_p5 = scmp.ne.s32.totalorder %s2297_s14, %s1799_s26  ;;  %p1803_p6 = scmp.lt.u32.totalorder %s1799_s26, %s2297_s14 }
 0x5be   :  { %p1805_p7 = pnand %p1803_p6, %p1800_p5 }
 0x5c0   :  { %1808 = shalt.err (!%p1805_p7)
}
 0x5c1   :  { %s1813_s1 = smov 128   ;;  %s1814_s29 = smov 8  }
 0x5c2   :  { %1314 = dma.vmem_to_hbm [thread:$0]  %s1309_s7, 768, %s2297_s14, [#allocation3], %s1813_s1, %s1813_s1, %s1814_s29  }
 0x5c3   :  { %1809 = dma.done.wait [#allocation3], 768  }
 0x5c4   :  { %1810 = vsyncadd [#allocation3], 4294966528 }
 0x5c5   :  { %1318 = vsyncpa [#allocation3], 1 }

</bundles_post_ra>
